<compile_context>
chip_gen: v7x
topology: tpu7x:2x2x1
jax: 0.10.0
libtpu: 0.0.40
codegen_flags: <defaults>
</compile_context>

<pallas_src>
import functools

import jax
import jax.numpy as jnp
from jax.experimental import pallas as pl
from jax.experimental.pallas import tpu as pltpu

BN_EPS = 1e-5  # nn.BatchNorm1d default eps


def _round_up(x, m):
    return (x + m - 1) // m * m


# --------------------------------------------------------------------------
# Kernel 1: stem conv-as-matmul + ReLU + per-image sum pooling (MXU form).
# Grid = (n_par parallel, tiles_per_par arbitrary); output block is resident
# across the reduction axis (P3 init/accumulate pattern).
# --------------------------------------------------------------------------
def stem_pool_kernel(patches_ref, wconv_ref, bconv_ref, part_ref, *,
                     patches_per_img):
    j = pl.program_id(1)

    @pl.when(j == 0)
    def _init():
        part_ref[...] = jnp.zeros_like(part_ref)

    # "backbone" stem: bf16 x bf16 on the MXU, f32 accumulate, bias + ReLU.
    x = jnp.dot(patches_ref[...], wconv_ref[...],
                preferred_element_type=jnp.float32)            # (TR, C) f32
    x = jnp.maximum(x + bconv_ref[...], 0.0)

    # In-kernel pooling mask: mask[b, t] = 1 iff global row (row0 + t) is a
    # real patch of image b.  Pad rows (>= B*P) match no image -> zero.
    tr = patches_ref.shape[0]
    n_imgs = part_ref.shape[1]
    row0 = (pl.program_id(0) * pl.num_programs(1) + j) * tr
    img = jax.lax.broadcasted_iota(jnp.int32, (n_imgs, tr), 0)
    rows = row0 + jax.lax.broadcasted_iota(jnp.int32, (n_imgs, tr), 1)
    lo = img * patches_per_img
    pool = ((rows >= lo) & (rows < lo + patches_per_img)).astype(jnp.bfloat16)

    # MXU-form sum pool, single-pass bf16 operands, exact f32 accumulator.
    part_ref[0] += jnp.dot(pool, x.astype(jnp.bfloat16),
                           preferred_element_type=jnp.float32)  # (B, C)


# --------------------------------------------------------------------------
# Kernel 2 (tiny epilogue): combine per-core partial sums, linear head,
# training-mode BatchNorm1d.  Keeps wlin/blin/gamma/beta out of kernel 1.
# --------------------------------------------------------------------------
def head_bn_kernel(part_ref, wlin_ref, blin_ref, gamma_ref, beta_ref, out_ref):
    pooled = jnp.sum(part_ref[...], axis=0)                    # (B, C) f32
    # 1/P mean-pool scale is folded into wlin once at init time.
    z = jnp.dot(pooled.astype(jnp.bfloat16), wlin_ref[...],
                preferred_element_type=jnp.float32) + blin_ref[...]  # (B, E_pad)
    # BatchNorm1d, training mode: batch stats, biased variance, f32.
    mu = jnp.mean(z, axis=0, keepdims=True)
    var = jnp.mean((z - mu) ** 2, axis=0, keepdims=True)
    out_ref[...] = (gamma_ref[...] * (z - mu) * jax.lax.rsqrt(var + BN_EPS)
                    + beta_ref[...])


def encoder_cnn(images, params, *, patch=4, tile_rows=1024):
    """images: (B, Cin, H, W) float32 NCHW.  Returns (B, embed_size) float32."""
    wconv, bconv, wlin, blin, gamma, beta = params
    B, Cin, H, W = images.shape
    ph, pw = H // patch, W // patch
    P = ph * pw
    K = Cin * patch * patch
    C = wconv.shape[1]
    E = wlin.shape[1]

    K_pad = _round_up(K, 128)                       # lane-align contraction dim
    E_pad = _round_up(E, 128)                       # lane-dense output store
    R = B * P
    # Big row tiles: per-step overhead (~0.35 us) dominates tiny tiles.
    TR = min(_round_up(max(tile_rows, 128), 128), _round_up(R, 128))
    total_tiles = -(-R // TR)
    n_par = 2 if total_tiles >= 2 else 1            # v7x: feed both TensorCores
    tiles_per_par = -(-total_tiles // n_par)
    R_pad = n_par * tiles_per_par * TR

    # ---- layout plumbing (im2col + zero pad); allow_input_fusion lets XLA
    #      fold this into the pallas_call input DMA instead of an HBM copy ----
    x = images.reshape(B, Cin, ph, patch, pw, patch)
    x = x.transpose(0, 2, 4, 1, 3, 5).reshape(R, K).astype(jnp.bfloat16)
    patches = jnp.pad(x, ((0, R_pad - R), (0, K_pad - K)))

    # pad / cast parameters (bf16 MXU operands; BN params stay f32)
    wconv_p = jnp.pad(wconv.astype(jnp.bfloat16), ((0, K_pad - K), (0, 0)))
    bconv_f = bconv.astype(jnp.float32)
    wlin_p = jnp.pad(wlin.astype(jnp.bfloat16), ((0, 0), (0, E_pad - E)))
    blin_p = jnp.pad(blin, ((0, 0), (0, E_pad - E)))
    gamma_p = jnp.pad(gamma, ((0, 0), (0, E_pad - E)))
    beta_p = jnp.pad(beta, ((0, 0), (0, E_pad - E)))

    # ---- call 1: stem + pooling, partial pooled sums per parallel slice ----
    partial = pl.pallas_call(
        functools.partial(stem_pool_kernel, patches_per_img=P),
        out_shape=jax.ShapeDtypeStruct((n_par, B, C), jnp.float32),
        grid_spec=pltpu.PrefetchScalarGridSpec(
            num_scalar_prefetch=0,
            grid=(n_par, tiles_per_par),
            in_specs=[
                pl.BlockSpec((TR, K_pad),
                             lambda p, j: (p * tiles_per_par + j, 0)),
                pl.BlockSpec((K_pad, C), lambda p, j: (0, 0)),   # resident weights
                pl.BlockSpec((1, C), lambda p, j: (0, 0)),
            ],
            out_specs=pl.BlockSpec((1, B, C), lambda p, j: (p, 0, 0)),
        ),
        compiler_params=pltpu.CompilerParams(
            dimension_semantics=("parallel", "arbitrary"),
            allow_input_fusion=[True, False, False],
        ),
    )(patches, wconv_p, bconv_f)

    # ---- call 2: tiny epilogue (linear + BatchNorm1d), fetched lazily ----
    out_padded = pl.pallas_call(
        head_bn_kernel,
        out_shape=jax.ShapeDtypeStruct((B, E_pad), jnp.float32),
        grid=(1,),
        in_specs=[
            pl.BlockSpec((n_par, B, C), lambda i: (0, 0, 0)),
            pl.BlockSpec((C, E_pad), lambda i: (0, 0)),
            pl.BlockSpec((1, E_pad), lambda i: (0, 0)),
            pl.BlockSpec((1, E_pad), lambda i: (0, 0)),
            pl.BlockSpec((1, E_pad), lambda i: (0, 0)),
        ],
        out_specs=pl.BlockSpec((B, E_pad), lambda i: (0, 0)),
        compiler_params=pltpu.CompilerParams(
            dimension_semantics=("arbitrary",),
        ),
    )(partial, wlin_p, blin_p, gamma_p, beta_p)

    return out_padded[:, :E]


def init_params(key, *, in_channels=3, patch=4, image_hw=(32, 32),
                feat_dim=128, embed_size=32):
    """Deterministic synthetic parameters (module shapes, scaled down)."""
    k1, k2, k3, k4 = jax.random.split(key, 4)
    K = in_channels * patch * patch
    P = (image_hw[0] // patch) * (image_hw[1] // patch)
    wconv = jax.random.normal(k1, (K, feat_dim), jnp.float32) * 0.05
    bconv = jax.random.normal(k2, (1, feat_dim), jnp.float32) * 0.01
    # nn.Linear(resnet.fc.in_features, embed_size); feat_dim stands in for 2048.
    # The 1/P average-pool scale is folded in here once, so the kernels do a
    # cheaper sum-pool.
    wlin = jax.random.normal(k3, (feat_dim, embed_size), jnp.float32) * 0.05
    wlin = wlin / float(P)
    blin = jax.random.normal(k4, (1, embed_size), jnp.float32) * 0.01
    # nn.BatchNorm1d(embed_size): gamma=1, beta=0 at init
    gamma = jnp.ones((1, embed_size), jnp.float32)
    beta = jnp.zeros((1, embed_size), jnp.float32)
    return wconv, bconv, wlin, blin, gamma, beta


if __name__ == "__main__":
    key = jax.random.PRNGKey(0)
    k_img, k_par = jax.random.split(key)

    B, Cin, H, W = 4, 3, 32, 32
    patch = 4
    feat_dim = 128
    embed_size = 32

    images = jax.random.normal(k_img, (B, Cin, H, W), jnp.float32)
    params = init_params(k_par, in_channels=Cin, patch=patch,
                         image_hw=(H, W), feat_dim=feat_dim,
                         embed_size=embed_size)

    fwd = jax.jit(lambda im, pr: encoder_cnn(im, pr, patch=patch,
                                             tile_rows=1024))
    out = jax.block_until_ready(fwd(images, params))
    assert out.shape == (B, embed_size) and out.dtype == jnp.float32
    print("KERNEL_OK")
</pallas_src>

<mosaic_0001>
module attributes {stable_mosaic.version = 11 : i64} {
  func.func @stem_pool_kernel(%arg0: i32, %arg1: i32, %arg2: memref<256x128xbf16, #tpu.memory_space<vmem>>, %arg3: memref<128x128xbf16, #tpu.memory_space<vmem>>, %arg4: memref<1x128xf32, #tpu.memory_space<vmem>>, %arg5: memref<1x4x128xf32, #tpu.memory_space<vmem>>) attributes {dimension_semantics = [#tpu.dimension_semantics<parallel>, #tpu.dimension_semantics<arbitrary>], iteration_bounds = array<i64: 1, 1>, scalar_prefetch = 0 : i64, scratch_operands = 0 : i64, tpu.core_type = #tpu.core_type<tc>, window_params = [{transform_indices = @transform_0, window_bounds = array<i64: 256, 128>}, {pipeline_mode = #tpu.pipeline_mode<synchronous>, transform_indices = @transform_1, window_bounds = array<i64: 128, 128>}, {pipeline_mode = #tpu.pipeline_mode<synchronous>, transform_indices = @transform_2, window_bounds = array<i64: 1, 128>}, {transform_indices = @transform_3, window_bounds = array<i64: 1, 4, 128>}]} {
    %c0_i32 = arith.constant 0 : i32
    %0 = arith.cmpi eq, %arg1, %c0_i32 : i32
    %1 = arith.extui %0 : i1 to i32
    %c0_i32_0 = arith.constant 0 : i32
    %2 = arith.cmpi ne, %1, %c0_i32_0 : i32
    scf.if %2 {
      %cst_15 = arith.constant 0.000000e+00 : f32
      %36 = vector.broadcast %cst_15 : f32 to vector<1x4x128xf32>
      %c0_16 = arith.constant 0 : index
      %c0_17 = arith.constant 0 : index
      %c0_18 = arith.constant 0 : index
      %37 = vector.load %arg5[%c0_16, %c0_17, %c0_18] : memref<1x4x128xf32, #tpu.memory_space<vmem>>, vector<1x4x128xf32>
      tpu.vector_store %arg5[%c0_16, %c0_17, %c0_18], %36 {strides = array<i32>} : memref<1x4x128xf32, #tpu.memory_space<vmem>>, vector<1x4x128xf32>,
    } else {
    }
    %c0 = arith.constant 0 : index
    %c0_1 = arith.constant 0 : index
    %3 = vector.load %arg2[%c0, %c0_1] : memref<256x128xbf16, #tpu.memory_space<vmem>>, vector<256x128xbf16>
    %c0_2 = arith.constant 0 : index
    %c0_3 = arith.constant 0 : index
    %4 = vector.load %arg3[%c0_2, %c0_3] : memref<128x128xbf16, #tpu.memory_space<vmem>>, vector<128x128xbf16>
    %cst = arith.constant dense<0.000000e+00> : vector<256x128xf32>
    %5 = tpu.matmul %3, %4, %cst {dimension_numbers = #tpu.dot_dimension_numbers<[1], [0], [0], [1], [0, 0, 1, 1], [], []>} : vector<256x128xbf16>, vector<128x128xbf16>, vector<256x128xf32> -> vector<256x128xf32>
    %c0_4 = arith.constant 0 : index
    %c0_5 = arith.constant 0 : index
    %6 = vector.load %arg4[%c0_4, %c0_5] : memref<1x128xf32, #tpu.memory_space<vmem>>, vector<1x128xf32>
    %7 = vector.broadcast %6 : vector<1x128xf32> to vector<256x128xf32>
    %8 = arith.addf %5, %7 : vector<256x128xf32>
    %cst_6 = arith.constant 0.000000e+00 : f32
    %9 = vector.broadcast %cst_6 : f32 to vector<256x128xf32>
    %10 = arith.maximumf %8, %9 : vector<256x128xf32>
    %c1_i32 = arith.constant 1 : i32
    %11 = arith.muli %arg0, %c1_i32 : i32
    %12 = arith.addi %11, %arg1 : i32
    %c256_i32 = arith.constant 256 : i32
    %13 = arith.muli %12, %c256_i32 : i32
    %14 = tpu.iota {dimensions = array<i32: 0>} : vector<4x256xi32>
    %15 = tpu.iota {dimensions = array<i32: 1>} : vector<4x256xi32>
    %16 = vector.broadcast %13 : i32 to vector<4x256xi32>
    %17 = arith.addi %16, %15 : vector<4x256xi32>
    %c64_i32 = arith.constant 64 : i32
    %18 = vector.broadcast %c64_i32 : i32 to vector<4x256xi32>
    %19 = arith.muli %14, %18 : vector<4x256xi32>
    %20 = arith.cmpi sge, %17, %19 : vector<4x256xi32>
    %c64_i32_7 = arith.constant 64 : i32
    %21 = vector.broadcast %c64_i32_7 : i32 to vector<4x256xi32>
    %22 = arith.addi %19, %21 : vector<4x256xi32>
    %23 = arith.cmpi slt, %17, %22 : vector<4x256xi32>
    %24 = arith.andi %20, %23 : vector<4x256xi1>
    %25 = arith.extui %24 : vector<4x256xi1> to vector<4x256xi32>
    %26 = arith.sitofp %25 : vector<4x256xi32> to vector<4x256xf32>
    %27 = arith.truncf %26 : vector<4x256xf32> to vector<4x256xbf16>
    %c0_8 = arith.constant 0 : index
    %c0_9 = arith.constant 0 : index
    %c0_10 = arith.constant 0 : index
    %28 = vector.load %arg5[%c0_8, %c0_9, %c0_10] : memref<1x4x128xf32, #tpu.memory_space<vmem>>, vector<1x4x128xf32>
    %29 = vector.shape_cast %28 : vector<1x4x128xf32> to vector<4x128xf32>
    %30 = arith.truncf %10 : vector<256x128xf32> to vector<256x128xbf16>
    %cst_11 = arith.constant dense<0.000000e+00> : vector<4x128xf32>
    %31 = tpu.matmul %27, %30, %cst_11 {dimension_numbers = #tpu.dot_dimension_numbers<[1], [0], [0], [1], [0, 0, 1, 1], [], []>} : vector<4x256xbf16>, vector<256x128xbf16>, vector<4x128xf32> -> vector<4x128xf32>
    %32 = arith.addf %29, %31 : vector<4x128xf32>
    %c0_12 = arith.constant 0 : index
    %c0_13 = arith.constant 0 : index
    %c0_14 = arith.constant 0 : index
    %33 = vector.load %arg5[%c0_12, %c0_13, %c0_14] : memref<1x4x128xf32, #tpu.memory_space<vmem>>, vector<1x4x128xf32>
    %34 = vector.shape_cast %33 : vector<1x4x128xf32> to vector<4x128xf32>
    %35 = vector.shape_cast %32 : vector<4x128xf32> to vector<1x4x128xf32>
    tpu.vector_store %arg5[%c0_12, %c0_13, %c0_14], %35 {strides = array<i32>} : memref<1x4x128xf32, #tpu.memory_space<vmem>>, vector<1x4x128xf32>,
    return
  }
  func.func @transform_0(%arg0: i32, %arg1: i32) -> (i32, i32) {
    %c1_i32 = arith.constant 1 : i32
    %0 = arith.muli %arg0, %c1_i32 : i32
    %1 = arith.addi %0, %arg1 : i32
    %c0_i32 = arith.constant 0 : i32
    %c0_i32_0 = arith.constant 0 : i32
    return %1, %c0_i32 : i32, i32
  }
  func.func @transform_1(%arg0: i32, %arg1: i32) -> (i32, i32) {
    %c0_i32 = arith.constant 0 : i32
    %c0_i32_0 = arith.constant 0 : i32
    %c0_i32_1 = arith.constant 0 : i32
    return %c0_i32, %c0_i32_0 : i32, i32
  }
  func.func @transform_2(%arg0: i32, %arg1: i32) -> (i32, i32) {
    %c0_i32 = arith.constant 0 : i32
    %c0_i32_0 = arith.constant 0 : i32
    %c0_i32_1 = arith.constant 0 : i32
    return %c0_i32, %c0_i32_0 : i32, i32
  }
  func.func @transform_3(%arg0: i32, %arg1: i32) -> (i32, i32, i32) {
    %c0_i32 = arith.constant 0 : i32
    %c0_i32_0 = arith.constant 0 : i32
    %c0_i32_1 = arith.constant 0 : i32
    return %arg0, %c0_i32, %c0_i32_0 : i32, i32, i32
  }
}

module attributes {stable_mosaic.version = 11 : i64} {
  func.func @head_bn_kernel(%arg0: i32, %arg1: memref<1x4x128xf32, #tpu.memory_space<vmem>>, %arg2: memref<128x128xbf16, #tpu.memory_space<vmem>>, %arg3: memref<1x128xf32, #tpu.memory_space<vmem>>, %arg4: memref<1x128xf32, #tpu.memory_space<vmem>>, %arg5: memref<1x128xf32, #tpu.memory_space<vmem>>, %arg6: memref<4x128xf32, #tpu.memory_space<vmem>>) attributes {dimension_semantics = [#tpu.dimension_semantics<arbitrary>], iteration_bounds = array<i64: 1>, scalar_prefetch = 0 : i64, scratch_operands = 0 : i64, tpu.core_type = #tpu.core_type<tc>, window_params = [{pipeline_mode = #tpu.pipeline_mode<synchronous>, transform_indices = @transform_0, window_bounds = array<i64: 1, 4, 128>}, {pipeline_mode = #tpu.pipeline_mode<synchronous>, transform_indices = @transform_1, window_bounds = array<i64: 128, 128>}, {pipeline_mode = #tpu.pipeline_mode<synchronous>, transform_indices = @transform_2, window_bounds = array<i64: 1, 128>}, {pipeline_mode = #tpu.pipeline_mode<synchronous>, transform_indices = @transform_3, window_bounds = array<i64: 1, 128>}, {pipeline_mode = #tpu.pipeline_mode<synchronous>, transform_indices = @transform_4, window_bounds = array<i64: 1, 128>}, {pipeline_mode = #tpu.pipeline_mode<synchronous>, transform_indices = @transform_5, window_bounds = array<i64: 4, 128>}]} {
    %c0 = arith.constant 0 : index
    %c0_0 = arith.constant 0 : index
    %c0_1 = arith.constant 0 : index
    %0 = vector.load %arg1[%c0, %c0_0, %c0_1] : memref<1x4x128xf32, #tpu.memory_space<vmem>>, vector<1x4x128xf32>
    %cst = arith.constant dense<0.000000e+00> : vector<4x128xf32>
    %1 = vector.multi_reduction <add>, %0, %cst [0] : vector<1x4x128xf32> to vector<4x128xf32>
    %2 = arith.truncf %1 : vector<4x128xf32> to vector<4x128xbf16>
    %c0_2 = arith.constant 0 : index
    %c0_3 = arith.constant 0 : index
    %3 = vector.load %arg2[%c0_2, %c0_3] : memref<128x128xbf16, #tpu.memory_space<vmem>>, vector<128x128xbf16>
    %cst_4 = arith.constant dense<0.000000e+00> : vector<4x128xf32>
    %4 = tpu.matmul %2, %3, %cst_4 {dimension_numbers = #tpu.dot_dimension_numbers<[1], [0], [0], [1], [0, 0, 1, 1], [], []>} : vector<4x128xbf16>, vector<128x128xbf16>, vector<4x128xf32> -> vector<4x128xf32>
    %c0_5 = arith.constant 0 : index
    %c0_6 = arith.constant 0 : index
    %5 = vector.load %arg3[%c0_5, %c0_6] : memref<1x128xf32, #tpu.memory_space<vmem>>, vector<1x128xf32>
    %6 = vector.broadcast %5 : vector<1x128xf32> to vector<4x128xf32>
    %7 = arith.addf %4, %6 : vector<4x128xf32>
    %cst_7 = arith.constant dense<0.000000e+00> : vector<128xf32>
    %8 = vector.multi_reduction <add>, %7, %cst_7 [0] : vector<4x128xf32> to vector<128xf32>
    %9 = vector.shape_cast %8 : vector<128xf32> to vector<1x128xf32>
    %cst_8 = arith.constant 4.000000e+00 : f32
    %10 = vector.broadcast %cst_8 : f32 to vector<1x128xf32>
    %11 = arith.divf %9, %10 : vector<1x128xf32>
    %12 = vector.broadcast %11 : vector<1x128xf32> to vector<4x128xf32>
    %13 = arith.subf %7, %12 : vector<4x128xf32>
    %14 = arith.mulf %13, %13 : vector<4x128xf32>
    %cst_9 = arith.constant dense<0.000000e+00> : vector<128xf32>
    %15 = vector.multi_reduction <add>, %14, %cst_9 [0] : vector<4x128xf32> to vector<128xf32>
    %16 = vector.shape_cast %15 : vector<128xf32> to vector<1x128xf32>
    %cst_10 = arith.constant 4.000000e+00 : f32
    %17 = vector.broadcast %cst_10 : f32 to vector<1x128xf32>
    %18 = arith.divf %16, %17 : vector<1x128xf32>
    %c0_11 = arith.constant 0 : index
    %c0_12 = arith.constant 0 : index
    %19 = vector.load %arg4[%c0_11, %c0_12] : memref<1x128xf32, #tpu.memory_space<vmem>>, vector<1x128xf32>
    %20 = vector.broadcast %11 : vector<1x128xf32> to vector<4x128xf32>
    %21 = arith.subf %7, %20 : vector<4x128xf32>
    %22 = vector.broadcast %19 : vector<1x128xf32> to vector<4x128xf32>
    %23 = arith.mulf %22, %21 : vector<4x128xf32>
    %cst_13 = arith.constant 9.99999974E-6 : f32
    %24 = vector.broadcast %cst_13 : f32 to vector<1x128xf32>
    %25 = arith.addf %18, %24 : vector<1x128xf32>
    %26 = math.rsqrt %25 : vector<1x128xf32>
    %27 = vector.broadcast %26 : vector<1x128xf32> to vector<4x128xf32>
    %28 = arith.mulf %23, %27 : vector<4x128xf32>
    %c0_14 = arith.constant 0 : index
    %c0_15 = arith.constant 0 : index
    %29 = vector.load %arg5[%c0_14, %c0_15] : memref<1x128xf32, #tpu.memory_space<vmem>>, vector<1x128xf32>
    %30 = vector.broadcast %29 : vector<1x128xf32> to vector<4x128xf32>
    %31 = arith.addf %28, %30 : vector<4x128xf32>
    %c0_16 = arith.constant 0 : index
    %c0_17 = arith.constant 0 : index
    %32 = vector.load %arg6[%c0_16, %c0_17] : memref<4x128xf32, #tpu.memory_space<vmem>>, vector<4x128xf32>
    tpu.vector_store %arg6[%c0_16, %c0_17], %31 {strides = array<i32>} : memref<4x128xf32, #tpu.memory_space<vmem>>, vector<4x128xf32>,
    return
  }
  func.func @transform_0(%arg0: i32) -> (i32, i32, i32) {
    %c0_i32 = arith.constant 0 : i32
    %c0_i32_0 = arith.constant 0 : i32
    %c0_i32_1 = arith.constant 0 : i32
    %c0_i32_2 = arith.constant 0 : i32
    return %c0_i32, %c0_i32_0, %c0_i32_1 : i32, i32, i32
  }
  func.func @transform_1(%arg0: i32) -> (i32, i32) {
    %c0_i32 = arith.constant 0 : i32
    %c0_i32_0 = arith.constant 0 : i32
    %c0_i32_1 = arith.constant 0 : i32
    return %c0_i32, %c0_i32_0 : i32, i32
  }
  func.func @transform_2(%arg0: i32) -> (i32, i32) {
    %c0_i32 = arith.constant 0 : i32
    %c0_i32_0 = arith.constant 0 : i32
    %c0_i32_1 = arith.constant 0 : i32
    return %c0_i32, %c0_i32_0 : i32, i32
  }
  func.func @transform_3(%arg0: i32) -> (i32, i32) {
    %c0_i32 = arith.constant 0 : i32
    %c0_i32_0 = arith.constant 0 : i32
    %c0_i32_1 = arith.constant 0 : i32
    return %c0_i32, %c0_i32_0 : i32, i32
  }
  func.func @transform_4(%arg0: i32) -> (i32, i32) {
    %c0_i32 = arith.constant 0 : i32
    %c0_i32_0 = arith.constant 0 : i32
    %c0_i32_1 = arith.constant 0 : i32
    return %c0_i32, %c0_i32_0 : i32, i32
  }
  func.func @transform_5(%arg0: i32) -> (i32, i32) {
    %c0_i32 = arith.constant 0 : i32
    %c0_i32_0 = arith.constant 0 : i32
    %c0_i32_1 = arith.constant 0 : i32
    return %c0_i32, %c0_i32_0 : i32, i32
  }
}

</mosaic_0001>

<bundles_post_ra>
// kernel: _lambda_.4
= control target key start
LH: loop header
LB: loop body
LE: loop exit
PB: predicated region body
PF: predicated region fallthrough
CT: control target
= control target key end

     0   :  { %s1737_s0 = inlined_call_operand.vmem [shape: bf16[128,128], index: 0, kind: input, shape index: {}]   ;;  %s1738_s1 = inlined_call_operand.vmem [shape: f32[1,128], index: 1, kind: input, shape index: {}]   ;;  %s1739_s2 = inlined_call_operand.vmem [shape: bf16[256,48], index: 2, kind: input, shape index: {}]   ;;  %s1740_s3 = inlined_call_operand.<no memory space> [shape: bf16[], index: 3, kind: input, shape index: {}]   ;;  %s1741_s4 = inlined_call_operand.vmem [shape: f32[1,4,128], index: 4, kind: output, shape index: {}]  }
   0x1   :  { %v9_v0 = vstv %s1740_s3 }
   0x2   :  { %v1447_v1 = vunpack.i.l.bf16 %v9_v0 }
   0x3   :  { %v1393_v2 = vld [vmem:[%s1737_s0] sm:$0xff]   ;;  %v54_v3 = vlaneseq  ;;  %v1394_v4 = vld [vmem:[%s1737_s0 + $0x8] sm:$0xff]   ;;  %v1417_v5 = vmov 0.0   ;;  %v1395_v6 = vld [vmem:[%s1737_s0 + $0x10] sm:$0xff]  }
   0x4   :  { %749 = vst [vmem:[%s1741_s4] sm:$0xf] %v1417_v5  ;;  %1343 = vmatprep.subr.bf16.mxu0 %v1393_v2  ;;  %v1396_v8 = vld [vmem:[%s1737_s0 + $0x18] sm:$0xff]   ;;  %v51_v9 = vld [vmem:[%s1739_s2] sm:$0xff]   ;;  %v1236_v10 = vld [vmem:[%s1739_s2 + $0x8] sm:$0xff]  }
   0x5   :  { %1344 = vmatpush3.bf16.msra.mxu0 %v1393_v2  ;;  %v1463_v7 = vand.u32 127, %v54_v3  ;;  %v1238_v11 = vld [vmem:[%s1739_s2 + $0x10] sm:$0xff]   ;;  %v52_v12 = vunpack.c.l.bf16 %v51_v9  ;;  %v73_v13 = vunpack.c.h.bf16 %v51_v9  ;;  %v95_v14 = vunpack.c.l.bf16 %v1236_v10  ;;  %v1240_v16 = vld [vmem:[%s1739_s2 + $0x18] sm:$0xff]   ;;  %v1397_v25 = vld [vmem:[%s1737_s0 + $0x20] sm:$0xff]  }
   0x6   :  { %1345 = vmatprep.subr.bf16.mxu0 %v1394_v4  ;;  %v117_v15 = vunpack.c.h.bf16 %v1236_v10  ;;  %v139_v17 = vunpack.c.l.bf16 %v1238_v11  ;;  %v161_v18 = vunpack.c.h.bf16 %v1238_v11  ;;  %v183_v19 = vunpack.c.l.bf16 %v1240_v16  ;;  %v1242_v30 = vld [vmem:[%s1739_s2 + $0x20] sm:$0xff]   ;;  %v1244_v31 = vld [vmem:[%s1739_s2 + $0x28] sm:$0xff]   ;;  %v1246_v36 = vld [vmem:[%s1739_s2 + $0x30] sm:$0xff]  }
   0x7   :  { %vm57_vm0 = vcmp.lt.s32.totalorder %v1463_v7, 48  ;;  %v205_v20 = vunpack.c.h.bf16 %v1240_v16  ;;  %v1248_v37 = vld [vmem:[%s1739_s2 + $0x38] sm:$0xff]   ;;  %v227_v42 = vunpack.c.l.bf16 %v1242_v30  ;;  %v249_v43 = vunpack.c.h.bf16 %v1242_v30  ;;  %v1398_v46 = vld [vmem:[%s1737_s0 + $0x28] sm:$0xff]   ;;  %v1250_v59 = vld [vmem:[%s1739_s2 + $0x40] sm:$0xff]  }
   0x8   :  { %v58_v21 = vsel %vm57_vm0, %v52_v12, %v1447_v1  ;;  %v79_v22 = vsel %vm57_vm0, %v73_v13, %v1447_v1  ;;  %v101_v23 = vsel %vm57_vm0, %v95_v14, %v1447_v1  ;;  %v123_v24 = vsel %vm57_vm0, %v117_v15, %v1447_v1  ;;  %v1252_v60 = vld [vmem:[%s1739_s2 + $0x48] sm:$0xff]   ;;  %v1254_v2 = vld [vmem:[%s1739_s2 + $0x50] sm:$0xff]   ;;  %v1258_v12 = vld [vmem:[%s1739_s2 + $0x60] sm:$0xff]  }
   0x9   :  { %1346 = vmatpush3.bf16.msra.mxu0 %v1394_v4  ;;  %v59_v26 = vpack.c.bf16 %v1417_v5, %v58_v21  ;;  %v81_v27 = vpack.c.bf16 %v1417_v5, %v79_v22  ;;  %v103_v28 = vpack.c.bf16 %v1417_v5, %v101_v23  ;;  %v125_v29 = vpack.c.bf16 %v1417_v5, %v123_v24  ;;  %v1256_v4 = vld [vmem:[%s1739_s2 + $0x58] sm:$0xff]  }
   0xa   :  { %1347 = vmatprep.subr.bf16.mxu0 %v1395_v6  ;;  %v145_v32 = vsel %vm57_vm0, %v139_v17, %v1447_v1  ;;  %v167_v33 = vsel %vm57_vm0, %v161_v18, %v1447_v1  ;;  %v189_v34 = vsel %vm57_vm0, %v183_v19, %v1447_v1  ;;  %v211_v35 = vsel %vm57_vm0, %v205_v20, %v1447_v1  ;;  %v1400_v22 = vld [vmem:[%s1737_s0 + $0x38] sm:$0xff]  }
   0xb   :  { %61 = vst [vmem:[#allocation7] sm:$0xf] %v59_v26  ;;  %83 = vst [vmem:[#allocation7 + $0x4] sm:$0xf] %v81_v27  ;;  %v147_v38 = vpack.c.bf16 %v1417_v5, %v145_v32  ;;  %v169_v39 = vpack.c.bf16 %v1417_v5, %v167_v33  ;;  %v191_v40 = vpack.c.bf16 %v1417_v5, %v189_v34  ;;  %v271_v44 = vunpack.c.l.bf16 %v1244_v31 }
   0xc   :  { %105 = vst [vmem:[#allocation7 + $0x8] sm:$0xf] %v103_v28  ;;  %127 = vst [vmem:[#allocation7 + $0xc] sm:$0xf] %v125_v29  ;;  %v213_v41 = vpack.c.bf16 %v1417_v5, %v211_v35  ;;  %v293_v45 = vunpack.c.h.bf16 %v1244_v31  ;;  %v315_v47 = vunpack.c.l.bf16 %v1246_v36  ;;  %v337_v48 = vunpack.c.h.bf16 %v1246_v36  ;;  %v1260_v31 = vld [vmem:[%s1739_s2 + $0x68] sm:$0xff]   ;;  %v1262_v36 = vld [vmem:[%s1739_s2 + $0x70] sm:$0xff]  }
   0xd   :  { %1348 = vmatpush3.bf16.msra.mxu0 %v1395_v6  ;;  %149 = vst [vmem:[#allocation7 + $0x10] sm:$0xf] %v147_v38  ;;  %171 = vst [vmem:[#allocation7 + $0x14] sm:$0xf] %v169_v39  ;;  %v359_v49 = vunpack.c.l.bf16 %v1248_v37  ;;  %v381_v50 = vunpack.c.h.bf16 %v1248_v37  ;;  %v233_v51 = vsel %vm57_vm0, %v227_v42, %v1447_v1  ;;  %v255_v52 = vsel %vm57_vm0, %v249_v43, %v1447_v1  ;;  %v1399_v6 = vld [vmem:[%s1737_s0 + $0x30] sm:$0xff]  }
   0xe   :  { %1349 = vmatprep.subr.bf16.mxu0 %v1396_v8  ;;  %193 = vst [vmem:[#allocation7 + $0x18] sm:$0xf] %v191_v40  ;;  %215 = vst [vmem:[#allocation7 + $0x1c] sm:$0xf] %v213_v41  ;;  %v277_v53 = vsel %vm57_vm0, %v271_v44, %v1447_v1  ;;  %v299_v54 = vsel %vm57_vm0, %v293_v45, %v1447_v1  ;;  %v235_v55 = vpack.c.bf16 %v1417_v5, %v233_v51  ;;  %v1264_v41 = vld [vmem:[%s1739_s2 + $0x78] sm:$0xff]  }
   0xf   :  { %v257_v56 = vpack.c.bf16 %v1417_v5, %v255_v52  ;;  %v279_v57 = vpack.c.bf16 %v1417_v5, %v277_v53  ;;  %v301_v58 = vpack.c.bf16 %v1417_v5, %v299_v54  ;;  %v321_v61 = vsel %vm57_vm0, %v315_v47, %v1447_v1 }
  0x10   :  { %v343_v62 = vsel %vm57_vm0, %v337_v48, %v1447_v1  ;;  %v365_v63 = vsel %vm57_vm0, %v359_v49, %v1447_v1  ;;  %v387_v0 = vsel %vm57_vm0, %v381_v50, %v1447_v1  ;;  %237 = vst [vmem:[#allocation7 + $0x20] sm:$0xf] %v235_v55  ;;  %v403_v14 = vunpack.c.l.bf16 %v1250_v59 }
  0x11   :  { %1350 = vmatpush3.bf16.msra.mxu0 %v1396_v8  ;;  %259 = vst [vmem:[#allocation7 + $0x24] sm:$0xf] %v257_v56  ;;  %281 = vst [vmem:[#allocation7 + $0x28] sm:$0xf] %v279_v57  ;;  %v323_v8 = vpack.c.bf16 %v1417_v5, %v321_v61  ;;  %v345_v9 = vpack.c.bf16 %v1417_v5, %v343_v62  ;;  %v367_v10 = vpack.c.bf16 %v1417_v5, %v365_v63 }
  0x12   :  { %1351 = vmatprep.subr.bf16.mxu0 %v1397_v25  ;;  %303 = vst [vmem:[#allocation7 + $0x2c] sm:$0xf] %v301_v58  ;;  %v389_v11 = vpack.c.bf16 %v1417_v5, %v387_v0  ;;  %v1401_v13 = vld [vmem:[#allocation7] sm:$0xff]   ;;  %v425_v15 = vunpack.c.h.bf16 %v1250_v59  ;;  %v447_v16 = vunpack.c.l.bf16 %v1252_v60  ;;  %v469_v17 = vunpack.c.h.bf16 %v1252_v60 }
  0x13   :  { %325 = vst [vmem:[#allocation7 + $0x30] sm:$0xf] %v323_v8  ;;  %347 = vst [vmem:[#allocation7 + $0x34] sm:$0xf] %v345_v9  ;;  %v491_v18 = vunpack.c.l.bf16 %v1254_v2  ;;  %v513_v19 = vunpack.c.h.bf16 %v1254_v2  ;;  %v535_v20 = vunpack.c.l.bf16 %v1256_v4  ;;  %v557_v21 = vunpack.c.h.bf16 %v1256_v4  ;;  %1359 = vmatprep.mubr.bf16.mxu0 %v1401_v13  ;;  %v1402_v54 = vld [vmem:[#allocation7 + $0x8] sm:$0xff]  }
  0x14   :  { %369 = vst [vmem:[#allocation7 + $0x38] sm:$0xf] %v367_v10  ;;  %391 = vst [vmem:[#allocation7 + $0x3c] sm:$0xf] %v389_v11  ;;  %v409_v23 = vsel %vm57_vm0, %v403_v14, %v1447_v1  ;;  %v431_v24 = vsel %vm57_vm0, %v425_v15, %v1447_v1  ;;  %v579_v26 = vunpack.c.l.bf16 %v1258_v12  ;;  %v475_v30 = vsel %vm57_vm0, %v469_v17, %v1447_v1  ;;  %v1403_v59 = vld [vmem:[#allocation7 + $0x10] sm:$0xff]  }
  0x15   :  { %1352 = vmatpush3.bf16.msra.mxu0 %v1397_v25  ;;  %v453_v25 = vsel %vm57_vm0, %v447_v16, %v1447_v1  ;;  %v411_v27 = vpack.c.bf16 %v1417_v5, %v409_v23  ;;  %v433_v28 = vpack.c.bf16 %v1417_v5, %v431_v24  ;;  %v477_v32 = vpack.c.bf16 %v1417_v5, %v475_v30  ;;  %v1404_v8 = vld [vmem:[#allocation7 + $0x18] sm:$0xff]  }
  0x16   :  { %1353 = vmatprep.subr.bf16.mxu0 %v1398_v46  ;;  %v455_v29 = vpack.c.bf16 %v1417_v5, %v453_v25  ;;  %v497_v33 = vsel %vm57_vm0, %v491_v18, %v1447_v1  ;;  %v519_v34 = vsel %vm57_vm0, %v513_v19, %v1447_v1  ;;  %v541_v35 = vsel %vm57_vm0, %v535_v20, %v1447_v1 }
  0x17   :  { %413 = vst [vmem:[#allocation7 + $0x40] sm:$0xf] %v411_v27  ;;  %435 = vst [vmem:[#allocation7 + $0x44] sm:$0xf] %v433_v28  ;;  %v499_v37 = vpack.c.bf16 %v1417_v5, %v497_v33  ;;  %v521_v38 = vpack.c.bf16 %v1417_v5, %v519_v34  ;;  %v543_v39 = vpack.c.bf16 %v1417_v5, %v541_v35  ;;  %v601_v44 = vunpack.c.h.bf16 %v1258_v12 }
  0x18   :  { %457 = vst [vmem:[#allocation7 + $0x48] sm:$0xf] %v455_v29  ;;  %v563_v40 = vsel %vm57_vm0, %v557_v21, %v1447_v1  ;;  %479 = vst [vmem:[#allocation7 + $0x4c] sm:$0xf] %v477_v32  ;;  %v585_v43 = vsel %vm57_vm0, %v579_v26, %v1447_v1  ;;  %v623_v45 = vunpack.c.l.bf16 %v1260_v31  ;;  %v645_v47 = vunpack.c.h.bf16 %v1260_v31  ;;  %v1405_v9 = vld [vmem:[#allocation7 + $0x20] sm:$0xff]  }
  0x19   :  { %1354 = vmatpush3.bf16.msra.mxu0 %v1398_v46  ;;  %v565_v42 = vpack.c.bf16 %v1417_v5, %v563_v40  ;;  %501 = vst [vmem:[#allocation7 + $0x50] sm:$0xf] %v499_v37  ;;  %523 = vst [vmem:[#allocation7 + $0x54] sm:$0xf] %v521_v38  ;;  %v587_v46 = vpack.c.bf16 %v1417_v5, %v585_v43  ;;  %v667_v48 = vunpack.c.l.bf16 %v1262_v36  ;;  %v689_v49 = vunpack.c.h.bf16 %v1262_v36  ;;  %v1406_v10 = vld [vmem:[#allocation7 + $0x28] sm:$0xff]  }
  0x1a   :  { %1355 = vmatprep.subr.bf16.mxu0 %v1399_v6  ;;  %545 = vst [vmem:[#allocation7 + $0x58] sm:$0xf] %v543_v39  ;;  %v607_v50 = vsel %vm57_vm0, %v601_v44, %v1447_v1  ;;  %v629_v51 = vsel %vm57_vm0, %v623_v45, %v1447_v1  ;;  %v711_v52 = vunpack.c.l.bf16 %v1264_v41  ;;  %v733_v53 = vunpack.c.h.bf16 %v1264_v41  ;;  %v1407_v11 = vld [vmem:[#allocation7 + $0x30] sm:$0xff]  }
  0x1b   :  { %567 = vst [vmem:[#allocation7 + $0x5c] sm:$0xf] %v565_v42  ;;  %589 = vst [vmem:[#allocation7 + $0x60] sm:$0xf] %v587_v46  ;;  %v609_v55 = vpack.c.bf16 %v1417_v5, %v607_v50  ;;  %v631_v56 = vpack.c.bf16 %v1417_v5, %v629_v51  ;;  %v651_v57 = vsel %vm57_vm0, %v645_v47, %v1447_v1  ;;  %v1408_v12 = vld [vmem:[#allocation7 + $0x38] sm:$0xff]   ;;  %v1145_v19 = vshrl.u32 %v54_v3, 7 }
  0x1c   :  { %v673_v58 = vsel %vm57_vm0, %v667_v48, %v1447_v1  ;;  %v653_v60 = vpack.c.bf16 %v1417_v5, %v651_v57  ;;  %v695_v62 = vsel %vm57_vm0, %v689_v49, %v1447_v1  ;;  %v717_v63 = vsel %vm57_vm0, %v711_v52, %v1447_v1  ;;  %v1669_v3 = vld [vmem:[%s1738_s1] ss:$0 sm:$0xff] }
  0x1d   :  { %1356 = vmatpush3.bf16.msra.mxu0 %v1399_v6  ;;  %v675_v61 = vpack.c.bf16 %v1417_v5, %v673_v58  ;;  %611 = vst [vmem:[#allocation7 + $0x64] sm:$0xf] %v609_v55  ;;  %633 = vst [vmem:[#allocation7 + $0x68] sm:$0xf] %v631_v56  ;;  %v697_v0 = vpack.c.bf16 %v1417_v5, %v695_v62  ;;  %v719_v2 = vpack.c.bf16 %v1417_v5, %v717_v63  ;;  %v1418_v23 = vmov 1.0|1.0  }
  0x1e   :  { %1357 = vmatprep.subr.bf16.mxu0 %v1400_v22  ;;  %v739_v4 = vsel %vm57_vm0, %v733_v53, %v1447_v1  ;;  %655 = vst [vmem:[#allocation7 + $0x6c] sm:$0xf] %v653_v60  ;;  %v1409_v13 = vld [vmem:[#allocation7 + $0x40] sm:$0xff]   ;;  %v1152_v20 = vmul.u32 64, %v1145_v19  ;;  %v1148_v21 = vadd.s32 128, %v1463_v7 }
  0x1f   :  { %677 = vst [vmem:[#allocation7 + $0x70] sm:$0xf] %v675_v61  ;;  %v741_v6 = vpack.c.bf16 %v1417_v5, %v739_v4  ;;  %699 = vst [vmem:[#allocation7 + $0x74] sm:$0xf] %v697_v0  ;;  %v1410_v1 = vld [vmem:[#allocation7 + $0x48] sm:$0xff]  }
  0x20   :  { %721 = vst [vmem:[#allocation7 + $0x78] sm:$0xf] %v719_v2  ;;  %v1411_v14 = vld [vmem:[#allocation7 + $0x50] sm:$0xff]   ;;  %vm1154_vm1 = vcmp.ge.s32.totalorder %v1148_v21, %v1152_v20  ;;  %vm1153_vm4 = vcmp.ge.s32.totalorder %v1463_v7, %v1152_v20 }
  0x21   :  { %1358 = vmatpush3.bf16.msra.mxu0 %v1400_v22  ;;  %743 = vst [vmem:[#allocation7 + $0x7c] sm:$0xf] %v741_v6  ;;  %v1155_v22 = vadd.s32 64, %v1152_v20 }
  0x22   :  { %v1412_v5 = vld [vmem:[#allocation7 + $0x58] sm:$0xff]  }
  0x23   :  { %vm1157_vm2 = vcmp.lt.s32.totalorder %v1148_v21, %v1155_v22  ;;  %vm1156_vm5 = vcmp.lt.s32.totalorder %v1463_v7, %v1155_v22 }
  0x24   :  { %1360 = vmatmul.mubr.bf16.vlgmr.msra.gmra.mrb[0].mxu0 %v1402_v54  ;;  %v1413_v15 = vld [vmem:[#allocation7 + $0x60] sm:$0xff]   ;;  %vm1159_vm3 = vmand %vm1154_vm1, %vm1157_vm2 }
  0x25   :  { %1363 = vmatprep.mubr.bf16.mxu0 %v1403_v59  ;;  %v1414_v16 = vld [vmem:[#allocation7 + $0x68] sm:$0xff]   ;;  %vm1293_vm6 = vmpackc.low %vm1159_vm3, %vm1159_vm3 }
  0x26   :  { %v1415_v17 = vld [vmem:[#allocation7 + $0x70] sm:$0xff]   ;;  %1294 = vmatprep.mubr.msk.bf16.mxu1 %vm1293_vm6, %v1418_v23  ;;  %vm1662_vm7 = vmand %vm1153_vm4, %vm1156_vm5 }
  0x27   :  { %vm1295_vm8 = vmpackc.low %vm1662_vm7, %vm1662_vm7 }
  0x28   :  { %v1416_v18 = vld [vmem:[#allocation7 + $0x78] sm:$0xff]  }
  0x2c   :  { %1364 = vmatmul.mubr.bf16.gmra.mrb[4].mxu0 %v1404_v8 }
  0x2d   :  { %1367 = vmatprep.mubr.bf16.mxu0 %v1405_v9 }
  0x34   :  { %1368 = vmatmul.mubr.bf16.gmra.mrb[8].mxu0 %v1406_v10 }
  0x35   :  { %1371 = vmatprep.mubr.bf16.mxu0 %v1407_v11 }
  0x3c   :  { %1372 = vmatmul.mubr.bf16.gmra.mrb[12].mxu0 %v1408_v12 }
  0x3d   :  { %1375 = vmatprep.mubr.bf16.mxu0 %v1409_v13 }
  0x44   :  { %1376 = vmatmul.mubr.bf16.gmra.mrb[16].mxu0 %v1410_v1 }
  0x45   :  { %1379 = vmatprep.mubr.bf16.mxu0 %v1411_v14 }
  0x4c   :  { %1380 = vmatmul.mubr.bf16.gmra.mrb[20].mxu0 %v1412_v5 }
  0x4d   :  { %1383 = vmatprep.mubr.bf16.mxu0 %v1413_v15 }
  0x54   :  { %1384 = vmatmul.mubr.bf16.gmra.mrb[24].mxu0 %v1414_v16 }
  0x55   :  { %1387 = vmatprep.mubr.bf16.mxu0 %v1415_v17 }
  0x5c   :  { %1388 = vmatmul.mubr.bf16.gmra.mrb[28].mxu0 %v1416_v18 }
  0xf7   :  { %v1361_v25 = vpop.f32.mrb[0].mxu0 }
  0xf8   :  { %v992_v26 = vadd.f32 %v1361_v25, %v1669_v3  ;;  %v983_v27 = vpop.f32.mrb[1].mxu0 }
  0xf9   :  { %v984_v28 = vadd.f32 %v1669_v3, %v983_v27  ;;  %v1362_v7 = vpop.f32.mrb[2].mxu0 }
  0xfa   :  { %v995_v29 = vadd.f32 %v1362_v7, %v1669_v3  ;;  %v986_v30 = vpop.f32.mrb[3].mxu0  ;;  %v1112_v32 = vmax.f32 %v992_v26, 0.0 }
  0xfb   :  { %v987_v31 = vadd.f32 %v1669_v3, %v986_v30  ;;  %v1110_v34 = vmax.f32 %v984_v28, 0.0 }
  0xfc   :  { %v1113_v33 = vmax.f32 %v995_v29, 0.0 }
  0xfd   :  { %v1111_v35 = vmax.f32 %v987_v31, 0.0 }
  0xfe   :  { %v1675_v36 = vpack.c.bf16 %v1113_v33, %v1112_v32 }
  0xff   :  { %v1365_v37 = vpop.f32.mrb[4].mxu0  ;;  %v1677_v38 = vpack.c.bf16 %v1111_v35, %v1110_v34 }
 0x100   :  { %v1008_v39 = vadd.f32 %v1365_v37, %v1669_v3  ;;  %v999_v40 = vpop.f32.mrb[5].mxu0 }
 0x101   :  { %v1000_v41 = vadd.f32 %v1669_v3, %v999_v40  ;;  %v1366_v42 = vpop.f32.mrb[6].mxu0 }
 0x102   :  { %v1011_v43 = vadd.f32 %v1366_v42, %v1669_v3  ;;  %v1002_v44 = vpop.f32.mrb[7].mxu0  ;;  %v1116_v46 = vmax.f32 %v1008_v39, 0.0 }
 0x103   :  { %v1003_v45 = vadd.f32 %v1669_v3, %v1002_v44  ;;  %v1114_v48 = vmax.f32 %v1000_v41, 0.0 }
 0x104   :  { %v1117_v47 = vmax.f32 %v1011_v43, 0.0 }
 0x105   :  { %v1115_v49 = vmax.f32 %v1003_v45, 0.0 }
 0x106   :  { %v1683_v50 = vpack.c.bf16 %v1117_v47, %v1116_v46 }
 0x107   :  { %v1685_v51 = vpack.c.bf16 %v1115_v49, %v1114_v48  ;;  %v1369_v52 = vpop.f32.mrb[8].mxu0 }
 0x108   :  { %v1024_v53 = vadd.f32 %v1369_v52, %v1669_v3  ;;  %v1015_v54 = vpop.f32.mrb[9].mxu0 }
 0x109   :  { %v1016_v55 = vadd.f32 %v1669_v3, %v1015_v54  ;;  %v1370_v56 = vpop.f32.mrb[10].mxu0 }
 0x10a   :  { %v1027_v57 = vadd.f32 %v1370_v56, %v1669_v3  ;;  %v1018_v58 = vpop.f32.mrb[11].mxu0  ;;  %v1120_v60 = vmax.f32 %v1024_v53, 0.0 }
 0x10b   :  { %v1019_v59 = vadd.f32 %v1669_v3, %v1018_v58  ;;  %v1118_v62 = vmax.f32 %v1016_v55, 0.0 }
 0x10c   :  { %v1121_v61 = vmax.f32 %v1027_v57, 0.0 }
 0x10d   :  { %v1119_v63 = vmax.f32 %v1019_v59, 0.0 }
 0x10e   :  { %v1691_v0 = vpack.c.bf16 %v1121_v61, %v1120_v60 }
 0x10f   :  { %v1693_v2 = vpack.c.bf16 %v1119_v63, %v1118_v62  ;;  %v1373_v4 = vpop.f32.mrb[12].mxu0 }
 0x110   :  { %v1040_v6 = vadd.f32 %v1373_v4, %v1669_v3  ;;  %v1031_v8 = vpop.f32.mrb[13].mxu0 }
 0x111   :  { %v1032_v9 = vadd.f32 %v1669_v3, %v1031_v8  ;;  %v1374_v10 = vpop.f32.mrb[14].mxu0 }
 0x112   :  { %v1043_v11 = vadd.f32 %v1374_v10, %v1669_v3  ;;  %v1034_v12 = vpop.f32.mrb[15].mxu0  ;;  %v1124_v1 = vmax.f32 %v1040_v6, 0.0 }
 0x113   :  { %v1035_v13 = vadd.f32 %v1669_v3, %v1034_v12  ;;  %v1122_v5 = vmax.f32 %v1032_v9, 0.0 }
 0x114   :  { %v1125_v14 = vmax.f32 %v1043_v11, 0.0 }
 0x115   :  { %v1123_v15 = vmax.f32 %v1035_v13, 0.0 }
 0x116   :  { %v1699_v16 = vpack.c.bf16 %v1125_v14, %v1124_v1 }
 0x117   :  { %v1701_v17 = vpack.c.bf16 %v1123_v15, %v1122_v5  ;;  %v1377_v18 = vpop.f32.mrb[16].mxu0 }
 0x118   :  { %v1056_v19 = vadd.f32 %v1377_v18, %v1669_v3  ;;  %v1047_v20 = vpop.f32.mrb[17].mxu0 }
 0x119   :  { %v1048_v21 = vadd.f32 %v1669_v3, %v1047_v20  ;;  %v1378_v22 = vpop.f32.mrb[18].mxu0 }
 0x11a   :  { %v1059_v25 = vadd.f32 %v1378_v22, %v1669_v3  ;;  %v1050_v26 = vpop.f32.mrb[19].mxu0  ;;  %v1128_v28 = vmax.f32 %v1056_v19, 0.0 }
 0x11b   :  { %v1051_v27 = vadd.f32 %v1669_v3, %v1050_v26  ;;  %v1126_v29 = vmax.f32 %v1048_v21, 0.0 }
 0x11c   :  { %v1129_v7 = vmax.f32 %v1059_v25, 0.0 }
 0x11d   :  { %v1127_v30 = vmax.f32 %v1051_v27, 0.0 }
 0x11e   :  { %v1176_v31 = vpack.c.bf16 %v1129_v7, %v1128_v28 }
 0x11f   :  { %v1381_v32 = vpop.f32.mrb[20].mxu0  ;;  %v1175_v33 = vpack.c.bf16 %v1127_v30, %v1126_v29 }
 0x120   :  { %v1072_v34 = vadd.f32 %v1381_v32, %v1669_v3  ;;  %v1063_v35 = vpop.f32.mrb[21].mxu0 }
 0x121   :  { %v1064_v37 = vadd.f32 %v1669_v3, %v1063_v35  ;;  %v1382_v39 = vpop.f32.mrb[22].mxu0  ;;  %1321 = vmatprep.subr.bf16.mxu1 %v1175_v33 }
 0x122   :  { %v1075_v40 = vadd.f32 %v1382_v39, %v1669_v3  ;;  %v1066_v41 = vpop.f32.mrb[23].mxu0  ;;  %1322 = vmatpush3.bf16.msra.mxu1 %v1677_v38  ;;  %v1132_v43 = vmax.f32 %v1072_v34, 0.0 }
 0x123   :  { %v1067_v42 = vadd.f32 %v1669_v3, %v1066_v41  ;;  %1323 = vmatprep.subr.bf16.mxu1 %v1176_v31  ;;  %v1130_v45 = vmax.f32 %v1064_v37, 0.0 }
 0x124   :  { %v1133_v44 = vmax.f32 %v1075_v40, 0.0 }
 0x125   :  { %v1131_v46 = vmax.f32 %v1067_v42, 0.0 }
 0x126   :  { %v1178_v47 = vpack.c.bf16 %v1133_v44, %v1132_v43  ;;  %1324 = vmatpush3.bf16.msra.mxu1 %v1675_v36 }
 0x127   :  { %v1177_v48 = vpack.c.bf16 %v1131_v46, %v1130_v45  ;;  %v1385_v49 = vpop.f32.mrb[24].mxu0 }
 0x128   :  { %v1088_v52 = vadd.f32 %v1385_v49, %v1669_v3  ;;  %v1079_v53 = vpop.f32.mrb[25].mxu0 }
 0x129   :  { %v1080_v54 = vadd.f32 %v1669_v3, %v1079_v53  ;;  %v1386_v55 = vpop.f32.mrb[26].mxu0  ;;  %1325 = vmatprep.subr.bf16.mxu1 %v1177_v48 }
 0x12a   :  { %v1091_v38 = vadd.f32 %v1386_v55, %v1669_v3  ;;  %v1082_v56 = vpop.f32.mrb[27].mxu0  ;;  %1326 = vmatpush3.bf16.msra.mxu1 %v1685_v51  ;;  %v1136_v58 = vmax.f32 %v1088_v52, 0.0 }
 0x12b   :  { %v1083_v57 = vadd.f32 %v1669_v3, %v1082_v56  ;;  %1327 = vmatprep.subr.bf16.mxu1 %v1178_v47  ;;  %v1134_v36 = vmax.f32 %v1080_v54, 0.0 }
 0x12c   :  { %v1137_v59 = vmax.f32 %v1091_v38, 0.0 }
 0x12d   :  { %v1135_v60 = vmax.f32 %v1083_v57, 0.0 }
 0x12e   :  { %v1180_v61 = vpack.c.bf16 %v1137_v59, %v1136_v58  ;;  %1328 = vmatpush3.bf16.msra.mxu1 %v1683_v50 }
 0x12f   :  { %v1179_v62 = vpack.c.bf16 %v1135_v60, %v1134_v36  ;;  %v1389_v63 = vpop.f32.mrb[28].mxu0 }
 0x130   :  { %v1104_v4 = vadd.f32 %v1389_v63, %v1669_v3  ;;  %v1095_v6 = vpop.f32.mrb[29].mxu0 }
 0x131   :  { %v1096_v8 = vadd.f32 %v1669_v3, %v1095_v6  ;;  %v1390_v9 = vpop.f32.mrb[30].mxu0  ;;  %1329 = vmatprep.subr.bf16.mxu1 %v1179_v62 }
 0x132   :  { %v1107_v51 = vadd.f32 %v1390_v9, %v1669_v3  ;;  %v1098_v10 = vpop.f32.mrb[31].mxu0  ;;  %1330 = vmatpush3.bf16.msra.mxu1 %v1693_v2  ;;  %v1140_v12 = vmax.f32 %v1104_v4, 0.0  ;;  %v1166_v2 = vld [vmem:[%s1741_s4] sm:$0xf] }
 0x133   :  { %v1099_v11 = vadd.f32 %v1669_v3, %v1098_v10  ;;  %1331 = vmatprep.subr.bf16.mxu1 %v1180_v61  ;;  %v1138_v50 = vmax.f32 %v1096_v8, 0.0 }
 0x134   :  { %v1141_v13 = vmax.f32 %v1107_v51, 0.0 }
 0x135   :  { %v1139_v1 = vmax.f32 %v1099_v11, 0.0 }
 0x136   :  { %v1182_v14 = vpack.c.bf16 %v1141_v13, %v1140_v12  ;;  %1332 = vmatpush3.bf16.msra.mxu1 %v1691_v0 }
 0x137   :  { %v1181_v5 = vpack.c.bf16 %v1139_v1, %v1138_v50 }
 0x139   :  { %1333 = vmatprep.subr.bf16.mxu1 %v1181_v5 }
 0x13a   :  { %1334 = vmatpush3.bf16.msra.mxu1 %v1701_v17 }
 0x13b   :  { %1335 = vmatprep.subr.bf16.mxu1 %v1182_v14 }
 0x13e   :  { %1336 = vmatpush3.bf16.msra.mxu1 %v1699_v16 }
 0x141   :  { %1296 = vmatmul.mubr.msk.bf16.vlgmr.msra.gmra.mrb[0].mxu1 %vm1295_vm8, %v1418_v23 }
 0x214   :  { %v1337_v3 = vpop.f32.mrb[0].mxu1 }
 0x215   :  { %v1338_v15 = vpop.f32.mrb[1].mxu1 }
 0x216   :  { %v1339_v0 = vadd.f32 %v1338_v15, %v1337_v3  ;;  %v1340_v18 = vpop.f32.mrb[2].mxu1 }
 0x217   :  { %v1341_v19 = vpop.f32.mrb[3].mxu1 }
 0x218   :  { %v1223_v20 = vadd.f32 %v1339_v0, %v1166_v2 }
 0x21a   :  { %1224 = vst [vmem:[%s1741_s4] sm:$0xf] %v1223_v20 }

// kernel: _lambda_.3
= control target key start
LH: loop header
LB: loop body
LE: loop exit
PB: predicated region body
PF: predicated region fallthrough
CT: control target
= control target key end

     0   :  { %v267_v1 = vmov 0.0   ;;  %vm268_vm0 = vmmov 0   ;;  %s348_s0 = inlined_call_operand.vmem [shape: f32[1,4,128], index: 0, kind: input, shape index: {}]   ;;  %s349_s1 = inlined_call_operand.vmem [shape: bf16[128,128], index: 1, kind: input, shape index: {}]   ;;  %s350_s2 = inlined_call_operand.vmem [shape: f32[1,128], index: 2, kind: input, shape index: {}]   ;;  %s351_s3 = inlined_call_operand.vmem [shape: f32[1,128], index: 3, kind: input, shape index: {}]   ;;  %s352_s4 = inlined_call_operand.vmem [shape: f32[1,128], index: 4, kind: input, shape index: {}]   ;;  %s353_s5 = inlined_call_operand.hbm [shape: f32[4,128], index: 5, kind: output, shape index: {}]  }
   0x1   :  { %v233_v0 = vld [vmem:[%s349_s1] sm:$0xff]   ;;  %210 = vmatprep.subr.bf16.mxu0 %v267_v1  ;;  %v234_v2 = vld [vmem:[%s349_s1 + $0x8] sm:$0xff]   ;;  %226 = vmatprep.mubr.msk.bf16.mxu0 %vm268_vm0, %v267_v1  ;;  %v235_v3 = vld [vmem:[%s349_s1 + $0x10] sm:$0xff]  }
   0x2   :  { %211 = vmatpush3.bf16.msra.mxu0 %v233_v0 }
   0x3   :  { %212 = vmatprep.subr.bf16.mxu0 %v267_v1 }
   0x6   :  { %213 = vmatpush3.bf16.msra.mxu0 %v234_v2 }
   0x7   :  { %214 = vmatprep.subr.bf16.mxu0 %v267_v1 }
   0x8   :  { %10 = vsyncpa [#allocation3], 0  ;;  %v236_v4 = vld [vmem:[%s349_s1 + $0x18] sm:$0xff]   ;;  %v237_v5 = vld [vmem:[%s349_s1 + $0x20] sm:$0xff]   ;;  %vm136_vm1 = vcmask 1043456   ;;  %s269_s14 = smov [#allocation2]  }
   0x9   :  { %v238_v6 = vld [vmem:[%s349_s1 + $0x28] sm:$0xff]   ;;  %v239_v7 = vld [vmem:[%s349_s1 + $0x30] sm:$0xff]   ;;  %v240_v8 = vld [vmem:[%s349_s1 + $0x38] sm:$0xff]   ;;  %s182_s15 = sshll.u32 %s269_s14, 4  ;;  %s183_s15 = int_to_ptr.vmem [resolvable:$true] %s182_s15 }
   0xa   :  { %215 = vmatpush3.bf16.msra.mxu0 %v235_v3  ;;  %v22_v9 = vld [vmem:[%s348_s0] sm:$0xf]  ;;  %s243_s16 = scalar_lea.vmem %s183_s15, 64  ;;  %p248_p1 = scmp.lt.s32.totalorder %s183_s15, %s183_s15 }
   0xb   :  { %216 = vmatprep.subr.bf16.mxu0 %v267_v1  ;;  %v24_v10 = vpack.c.bf16 %v22_v9, %v22_v9  ;;  %v190_v11 = vld [vmem:[%s350_s2] ss:$0 sm:$0xff]  ;;  %p244_p0 = scmp.ne.s32.totalorder %s183_s15, %s243_s16  ;;  %p249_p2 = scmp.lt.s32.totalorder %s243_s16, %s243_s16 }
   0xc   :  { %v199_v36 = vld [vmem:[%s351_s3] ss:$0 sm:$0xff] }
   0xd   :  { %v200_v39 = vld [vmem:[%s352_s4] ss:$0 sm:$0xff]  ;;  %p250_p3 = por %p249_p2, %p248_p1 }
   0xe   :  { %217 = vmatpush3.bf16.msra.mxu0 %v236_v4 }
   0xf   :  { %218 = vmatprep.subr.bf16.mxu0 %v267_v1  ;;  %p251_p4 = pnand %p250_p3, %p244_p0 }
  0x12   :  { %219 = vmatpush3.bf16.msra.mxu0 %v237_v5 }
  0x13   :  { %220 = vmatprep.subr.bf16.mxu0 %v267_v1 }
  0x16   :  { %221 = vmatpush3.bf16.msra.mxu0 %v238_v6 }
  0x17   :  { %222 = vmatprep.subr.bf16.mxu0 %v267_v1 }
  0x1a   :  { %223 = vmatpush3.bf16.msra.mxu0 %v239_v7 }
  0x1b   :  { %224 = vmatprep.subr.bf16.mxu0 %v267_v1 }
  0x1e   :  { %225 = vmatpush3.bf16.msra.mxu0 %v240_v8 }
  0x21   :  { %227 = vmatmul.mubr.bf16.vlgmr.msra.gmra.mrb[0].mxu0 %v24_v10 }
  0xf4   :  { %v130_v12 = vpop.f32.mrb[0].mxu0 }
  0xf5   :  { %v131_v13 = vadd.f32 %v190_v11, %v130_v12  ;;  %v228_v14 = vpop.f32.mrb[1].mxu0 }
  0xf6   :  { %v133_v15 = vpop.f32.mrb[2].mxu0 }
  0xf7   :  { %v137_v16 = vsel %vm136_vm1, %v131_v13, 0.0  ;;  %v229_v17 = vpop.f32.mrb[3].mxu0 }
  0xf8   :  { %v138_v18 = vrot.slane %v137_v16, 4 }
  0xfa   :  { %v139_v19 = vadd.f32 %v138_v18, %v137_v16 }
  0xfc   :  { %v140_v20 = vrot.slane %v139_v19, 2 }
  0xfe   :  { %v141_v21 = vadd.f32 %v140_v20, %v139_v19 }
 0x100   :  { %v142_v22 = vrot.slane %v141_v21, 1 }
 0x102   :  { %v143_v23 = vadd.f32 %v142_v22, %v141_v21 }
 0x104   :  { %v145_v24 = vmul.f32 0.25, %v143_v23 }
 0x106   :  { %v146_v25 = vsub.f32 %v131_v13, %v145_v24 }
 0x108   :  { %v147_v26 = vmul.f32 %v146_v25, %v146_v25  ;;  %v163_v37 = vmul.f32 %v199_v36, %v146_v25 }
 0x10a   :  { %v148_v27 = vsel %vm136_vm1, %v147_v26, 0.0 }
 0x10b   :  { %v149_v28 = vrot.slane %v148_v27, 4 }
 0x10d   :  { %v150_v29 = vadd.f32 %v149_v28, %v148_v27 }
 0x10f   :  { %v151_v30 = vrot.slane %v150_v29, 2 }
 0x111   :  { %v152_v31 = vadd.f32 %v151_v30, %v150_v29 }
 0x113   :  { %v153_v32 = vrot.slane %v152_v31, 1 }
 0x115   :  { %v154_v33 = vadd.f32 %v153_v32, %v152_v31 }
 0x117   :  { %v155_v34 = vmul.f32 0.25, %v154_v33 }
 0x119   :  { %v164_v35 = vadd.f32 1e-05, %v155_v34 }
 0x11b   :  { %241 = vrsqrt.f32 %v164_v35 }
 0x125   :  { %v242_v38 = vpop.eup %241 }
 0x126   :  { %v166_v40 = vmul.f32 %v242_v38, %v163_v37 }
 0x128   :  { %v174_v41 = vadd.f32 %v200_v39, %v166_v40 }
 0x12a   :  { %175 = vst [vmem:[#allocation2] sm:$0xf] %v174_v41 }
 0x12b   :  { %254 = shalt.err (!%p251_p4)
}
 0x12c   :  { %s255_s18 = scalar_lea.hbm %s353_s5, 64 }
 0x12d   :  { %p256_p5 = scmp.ne.s32.totalorder %s353_s5, %s255_s18  ;;  %p259_p6 = scmp.lt.u32.totalorder %s255_s18, %s353_s5 }
 0x12f   :  { %p261_p7 = pnand %p259_p6, %p256_p5 }
 0x131   :  { %264 = shalt.err (!%p261_p7)
}
 0x132   :  { %185 = dma.vmem_to_hbm [thread:$0]  %s183_s15, 64, %s353_s5, [#allocation3]  }
 0x133   :  { %265 = dma.done.wait [#allocation3], 64  }
 0x134   :  { %266 = vsyncadd [#allocation3], 4294967232 }
 0x135   :  { %189 = vsyncpa [#allocation3], 1 }

</bundles_post_ra>
